<compile_context>
chip_gen: v6e
topology: v6e:2x2x1
jax: 0.10.0
libtpu: 0.0.40
codegen_flags: <defaults>
</compile_context>

<pallas_src>
import functools

import jax
import jax.numpy as jnp
from jax.experimental import pallas as pl
from jax.experimental.pallas import tpu as pltpu

_LOG_2PI = float(jnp.log(2.0 * jnp.pi))  # only used by the pure-JAX reference; cancels in the KL


def _ar1_kl_kernel(mean_ref, std_ref, eps_ref, alpha_ref, invvar_ref, out_ref, *, d):
    # Blocks are (TB, T*D); the lane axis carries flattened (t, d).
    mean = mean_ref[...].astype(jnp.float32)
    std = std_ref[...].astype(jnp.float32)
    eps = eps_ref[...].astype(jnp.float32)
    alpha_row = alpha_ref[...]     # (1, T*D): 0 on t==0 lanes, alpha_d elsewhere
    invvar_row = invvar_ref[...]   # (1, T*D): 1/pvar on t==0 lanes, 1/nvar elsewhere

    # posterior rsample
    sample = mean + std * eps

    # prev[t, d] = sample[t-1, d]  <=>  lane shift by D (XLU). The wrapped t==0 lanes
    # are garbage but get multiplied by alpha_row == 0 there.
    prev = pltpu.roll(sample, shift=d, axis=1)
    diff = sample - alpha_row * prev

    # KL element = log_q - log_p with the -0.5*log(2*pi) terms cancelled and the
    # -0.5*log(var) prior term hoisted to the wrapper (closed form in the params).
    kl = 0.5 * (diff * diff) * invvar_row - 0.5 * (eps * eps) - jnp.log(std)

    partial = jnp.sum(kl)
    # Splat the block's partial sum into a full (8,128) tile (lane-dense, unmasked store).
    out_ref[...] = jnp.full(out_ref.shape, partial, dtype=out_ref.dtype)


def _pick_block_b(B, TD, budget_bytes=8 << 20):
    """Largest batch tile that divides B, is a multiple of 8, and fits the VMEM budget
    for 3 double-buffered f32 input streams (conservative for v7x's 64 MiB VMEM)."""
    per_row = 3 * 2 * TD * 4
    cap = max(1, budget_bytes // per_row)
    if B <= 8 or B % 8 != 0:
        return B  # block == full batch dim is always a legal block shape
    tb = min(B, max(8, (cap // 8) * 8))
    while B % tb != 0:
        tb -= 8
    return tb


def ar1_mvn_kl(post_mean, post_std, eps, logtaus, lognvars, *, block_b=None):
    """Returns scalar mean KL (log_q - log_p averaged over batch)."""
    B, T, D = post_mean.shape
    TD = T * D
    f32 = jnp.float32

    # --- parameter precompute (tiny, once per call, hoisted out of the grid loop) ---
    logtaus = logtaus.reshape(D).astype(f32)
    lognvars = lognvars.reshape(D).astype(f32)
    alphas = jnp.exp(-1.0 / jnp.exp(logtaus))
    logpvars = lognvars - jnp.log(1.0 - alphas * alphas)     # stationary (process) log-var
    inv_nvar = jnp.exp(-lognvars)
    inv_pvar = jnp.exp(-logpvars)
    # lane l = t*D + d ; t==0 lanes are the first D lanes
    alpha_row = jnp.concatenate([jnp.zeros((D,), f32), jnp.tile(alphas, T - 1)]).reshape(1, TD)
    invvar_row = jnp.concatenate([inv_pvar, jnp.tile(inv_nvar, T - 1)]).reshape(1, TD)
    # Hoisted prior log-variance contribution to the per-batch KL: +0.5*sum(log var).
    hoist = 0.5 * ((T - 1) * jnp.sum(lognvars) + jnp.sum(logpvars))

    if block_b is None:
        block_b = _pick_block_b(B, TD)
    assert B % block_b == 0, (B, block_b)
    grid_b = B // block_b

    # lane-dense layout: flatten (T, D) onto the lane axis (free reshape in XLA)
    mean2 = post_mean.reshape(B, TD)
    std2 = post_std.reshape(B, TD)
    eps2 = eps.reshape(B, TD)

    kernel = functools.partial(_ar1_kl_kernel, d=D)
    out = pl.pallas_call(
        kernel,
        out_shape=jax.ShapeDtypeStruct((8, grid_b * 128), f32),
        grid=(grid_b,),
        in_specs=[
            pl.BlockSpec((block_b, TD), lambda i: (i, 0)),
            pl.BlockSpec((block_b, TD), lambda i: (i, 0)),
            pl.BlockSpec((block_b, TD), lambda i: (i, 0)),
            pl.BlockSpec((1, TD), lambda i: (0, 0)),
            pl.BlockSpec((1, TD), lambda i: (0, 0)),
        ],
        out_specs=pl.BlockSpec((8, 128), lambda i: (0, i)),
        compiler_params=pltpu.CompilerParams(
            dimension_semantics=("parallel",),
            vmem_limit_bytes=32 * 1024 * 1024,
        ),
    )(mean2, std2, eps2, alpha_row, invvar_row)

    partials = out[0, ::128]              # one splatted partial per grid block
    return jnp.sum(partials) / B + hoist


def _ref_kl(post_mean, post_std, eps, logtaus, lognvars):
    """Pure-JAX reference mirroring the PyTorch module (full formulas, no hoisting)."""
    sample = post_mean + post_std * eps
    log_q = jnp.sum(-0.5 * eps ** 2 - jnp.log(post_std) - 0.5 * _LOG_2PI, axis=(1, 2))
    alphas = jnp.exp(-1.0 / jnp.exp(logtaus))
    logpvars = lognvars - jnp.log(1.0 - alphas ** 2)
    prev = jnp.roll(sample, 1, axis=1)
    means = alphas * prev
    means = means.at[:, 0].set(0.0)
    logvars = jnp.broadcast_to(lognvars, sample.shape)
    logvars = logvars.at[:, 0].set(logpvars)
    log_p = jnp.sum(-0.5 * (sample - means) ** 2 / jnp.exp(logvars)
                    - 0.5 * logvars - 0.5 * _LOG_2PI, axis=(1, 2))
    return jnp.mean(log_q - log_p)


if __name__ == "__main__":
    # Module params: AutoregressiveMultivariateNormal(tau=10.0, nvar=0.1, shape=D)
    B, T, D = 16, 8, 32
    tau, nvar = 10.0, 0.1
    logtaus = jnp.log(jnp.ones((D,), jnp.float32) * tau)
    lognvars = jnp.log(jnp.ones((D,), jnp.float32) * nvar)

    key = jax.random.PRNGKey(0)
    k1, k2, k3 = jax.random.split(key, 3)
    post_mean = jax.random.normal(k1, (B, T, D), jnp.float32)
    post_std = 0.1 + jax.nn.softplus(jax.random.normal(k2, (B, T, D), jnp.float32))
    # rsample noise generated in plain JAX (glue) so the kernel bit-matches the reference.
    eps = jax.random.normal(k3, (B, T, D), jnp.float32)

    kl = ar1_mvn_kl(post_mean, post_std, eps, logtaus, lognvars, block_b=8)
    jax.block_until_ready(kl)

    kl_ref = _ref_kl(post_mean, post_std, eps, logtaus, lognvars)
    assert jnp.allclose(kl, kl_ref, rtol=1e-4, atol=1e-2), (kl, kl_ref)
    print("KERNEL_OK")
</pallas_src>

<mosaic_0001>
module attributes {stable_mosaic.version = 11 : i64} {
  func.func @_ar1_kl_kernel(%arg0: i32, %arg1: memref<8x256xf32, #tpu.memory_space<vmem>>, %arg2: memref<8x256xf32, #tpu.memory_space<vmem>>, %arg3: memref<8x256xf32, #tpu.memory_space<vmem>>, %arg4: memref<1x256xf32, #tpu.memory_space<vmem>>, %arg5: memref<1x256xf32, #tpu.memory_space<vmem>>, %arg6: memref<8x128xf32, #tpu.memory_space<vmem>>) attributes {dimension_semantics = [#tpu.dimension_semantics<parallel>], iteration_bounds = array<i64: 2>, scalar_prefetch = 0 : i64, scratch_operands = 0 : i64, tpu.core_type = #tpu.core_type<tc>, window_params = [{transform_indices = @transform_0, window_bounds = array<i64: 8, 256>}, {transform_indices = @transform_1, window_bounds = array<i64: 8, 256>}, {transform_indices = @transform_2, window_bounds = array<i64: 8, 256>}, {pipeline_mode = #tpu.pipeline_mode<synchronous>, transform_indices = @transform_3, window_bounds = array<i64: 1, 256>}, {pipeline_mode = #tpu.pipeline_mode<synchronous>, transform_indices = @transform_4, window_bounds = array<i64: 1, 256>}, {transform_indices = @transform_5, window_bounds = array<i64: 8, 128>}]} {
    %c0 = arith.constant 0 : index
    %c0_0 = arith.constant 0 : index
    %0 = vector.load %arg1[%c0, %c0_0] : memref<8x256xf32, #tpu.memory_space<vmem>>, vector<8x256xf32>
    %c0_1 = arith.constant 0 : index
    %c0_2 = arith.constant 0 : index
    %1 = vector.load %arg2[%c0_1, %c0_2] : memref<8x256xf32, #tpu.memory_space<vmem>>, vector<8x256xf32>
    %c0_3 = arith.constant 0 : index
    %c0_4 = arith.constant 0 : index
    %2 = vector.load %arg3[%c0_3, %c0_4] : memref<8x256xf32, #tpu.memory_space<vmem>>, vector<8x256xf32>
    %c0_5 = arith.constant 0 : index
    %c0_6 = arith.constant 0 : index
    %3 = vector.load %arg4[%c0_5, %c0_6] : memref<1x256xf32, #tpu.memory_space<vmem>>, vector<1x256xf32>
    %c0_7 = arith.constant 0 : index
    %c0_8 = arith.constant 0 : index
    %4 = vector.load %arg5[%c0_7, %c0_8] : memref<1x256xf32, #tpu.memory_space<vmem>>, vector<1x256xf32>
    %5 = arith.mulf %1, %2 : vector<8x256xf32>
    %6 = arith.addf %0, %5 : vector<8x256xf32>
    %c32_i32 = arith.constant 32 : i32
    %7 = tpu.dynamic_rotate %6 by %c32_i32 dim 1 : vector<8x256xf32>, i32 -> vector<8x256xf32>
    %8 = vector.broadcast %3 : vector<1x256xf32> to vector<8x256xf32>
    %9 = arith.mulf %8, %7 : vector<8x256xf32>
    %10 = arith.subf %6, %9 : vector<8x256xf32>
    %11 = arith.mulf %10, %10 : vector<8x256xf32>
    %cst = arith.constant 5.000000e-01 : f32
    %12 = vector.broadcast %cst : f32 to vector<8x256xf32>
    %13 = arith.mulf %12, %11 : vector<8x256xf32>
    %14 = vector.broadcast %4 : vector<1x256xf32> to vector<8x256xf32>
    %15 = arith.mulf %13, %14 : vector<8x256xf32>
    %16 = arith.mulf %2, %2 : vector<8x256xf32>
    %cst_9 = arith.constant 5.000000e-01 : f32
    %17 = vector.broadcast %cst_9 : f32 to vector<8x256xf32>
    %18 = arith.mulf %17, %16 : vector<8x256xf32>
    %19 = arith.subf %15, %18 : vector<8x256xf32>
    %20 = math.log %1 : vector<8x256xf32>
    %21 = arith.subf %19, %20 : vector<8x256xf32>
    %22 = vector.shape_cast %21 : vector<8x256xf32> to vector<1x8x256xf32>
    %cst_10 = arith.constant dense<0.000000e+00> : vector<1xf32>
    %23 = vector.multi_reduction <add>, %22, %cst_10 [1, 2] : vector<1x8x256xf32> to vector<1xf32>
    %24 = vector.shape_cast %23 : vector<1xf32> to vector<1x1x1xf32>
    %25 = vector.extract %24[0, 0, 0] : f32 from vector<1x1x1xf32>
    %26 = vector.broadcast %25 : f32 to vector<8x128xf32>
    %c0_11 = arith.constant 0 : index
    %c0_12 = arith.constant 0 : index
    %27 = vector.load %arg6[%c0_11, %c0_12] : memref<8x128xf32, #tpu.memory_space<vmem>>, vector<8x128xf32>
    tpu.vector_store %arg6[%c0_11, %c0_12], %26 {strides = array<i32>} : memref<8x128xf32, #tpu.memory_space<vmem>>, vector<8x128xf32>,
    return
  }
  func.func @transform_0(%arg0: i32) -> (i32, i32) {
    %c0_i32 = arith.constant 0 : i32
    %c0_i32_0 = arith.constant 0 : i32
    return %arg0, %c0_i32 : i32, i32
  }
  func.func @transform_1(%arg0: i32) -> (i32, i32) {
    %c0_i32 = arith.constant 0 : i32
    %c0_i32_0 = arith.constant 0 : i32
    return %arg0, %c0_i32 : i32, i32
  }
  func.func @transform_2(%arg0: i32) -> (i32, i32) {
    %c0_i32 = arith.constant 0 : i32
    %c0_i32_0 = arith.constant 0 : i32
    return %arg0, %c0_i32 : i32, i32
  }
  func.func @transform_3(%arg0: i32) -> (i32, i32) {
    %c0_i32 = arith.constant 0 : i32
    %c0_i32_0 = arith.constant 0 : i32
    %c0_i32_1 = arith.constant 0 : i32
    return %c0_i32, %c0_i32_0 : i32, i32
  }
  func.func @transform_4(%arg0: i32) -> (i32, i32) {
    %c0_i32 = arith.constant 0 : i32
    %c0_i32_0 = arith.constant 0 : i32
    %c0_i32_1 = arith.constant 0 : i32
    return %c0_i32, %c0_i32_0 : i32, i32
  }
  func.func @transform_5(%arg0: i32) -> (i32, i32) {
    %c0_i32 = arith.constant 0 : i32
    %c0_i32_0 = arith.constant 0 : i32
    return %c0_i32, %arg0 : i32, i32
  }
}

</mosaic_0001>

<bundles_post_ra>
// kernel: tpu_custom_call.1
= control target key start
LH: loop header
LB: loop body
LE: loop exit
PB: predicated region body
PF: predicated region fallthrough
CT: control target
= control target key end

     0   :  { %s1008_s0 = inlined_call_operand.hbm [shape: f32[16,256], index: 0, kind: input, shape index: {}]   ;;  %s1009_s1 = inlined_call_operand.hbm [shape: f32[16,256], index: 1, kind: input, shape index: {}]   ;;  %s1010_s2 = inlined_call_operand.hbm [shape: f32[16,256], index: 2, kind: input, shape index: {}]   ;;  %s1011_s3 = inlined_call_operand.vmem [shape: f32[1,256], index: 3, kind: input, shape index: {}]   ;;  %s1012_s4 = inlined_call_operand.vmem [shape: f32[1,256], index: 4, kind: input, shape index: {}]   ;;  %s1013_s5 = inlined_call_operand.hbm [shape: f32[8,256], index: 5, kind: output, shape index: {}]  }
   0x1   :  { %1020 = sst [smem:[#allocation15_spill]] %s1008_s0 }
   0x2   :  { %1021 = sst [smem:[#allocation16_spill]] %s1009_s1 }
   0x3   :  { %10 = vsyncpa [#allocation3], 0 }
   0x4   :  { %12 = vsyncpa [#allocation3 + $0x1], 0 }
   0x5   :  { %13 = vsyncpa [#allocation6], 0 }
   0x6   :  { %15 = vsyncpa [#allocation6 + $0x1], 0 }
   0x7   :  { %16 = vsyncpa [#allocation4], 0 }
   0x8   :  { %18 = vsyncpa [#allocation4 + $0x1], 0  ;;  %s794_s18 = smov 0   ;;  %s796_s19 = smov 0  }
   0x9   :  { %s798_s20 = smov 0   ;;  %s800_s21 = smov 0  }
   0xa LB: > { %1022 = sst [smem:[#allocation12_spill]] %s753_s20  ;;  %s815_s22 = sadd.s32 4294967295, %s757_s21   ;;  %s757_s21 = sphi %s800_s21, %s1040_s21   ;;  %s753_s20 = sphi %s798_s20, %s1042_s20   ;;  %s749_s19 = sphi %s796_s19, %s1044_s19   ;;  %s745_s18 = sphi %s794_s18, %s1043_s18  }
   0xb   : > { %s518_s23 = sadd.s32 4294967294, %s757_s21   ;;  %s819_s24 = sadd.s32 1, %s757_s21  }
   0xc   : > { %1023 = sst [smem:[#allocation13_spill]] %s819_s24  ;;  %s31_s25 = sadd.s32 1, %s753_s20 }
   0xd   : > { %s28_s26 = ssub.s32 %s757_s21, %s819_s24  ;;  %p38_p0 = scmp.ne.s32.totalorder %s753_s20, %s749_s19 }
   0xe   : > { %p29_p1 = scmp.eq.s32.totalorder %s28_s26, 0  ;;  %p39_p2 = scmp.eq.s32.totalorder %s757_s21, 0 }
   0xf   : > { %p44_p3 = scmp.ne.s32.totalorder %s749_s19, %s745_s18  ;;  %p45_p4 = scmp.eq.s32.totalorder %s815_s22, 0 }
  0x10   : > { %s831_s27 = scalar_select %p29_p1, %s753_s20, %s31_s25  }
  0x11   : > { %p40_p5 = por %p39_p2, %p38_p0  ;;  %p833_p6 = por %p45_p4, %p44_p3 }
  0x12   : > { %1024 = sst [smem:[#allocation14_spill]] %s831_s27  ;;  %p162_p7 = scmp.eq.s32.totalorder %s815_s22, 1 }
  0x13   : > { %s1025_s28 = scalar_select %p833_p6, 1, 0 }
  0x14   : > { %p168_p8 = scmp.eq.s32.totalorder %s518_s23, 1  ;;  %p566_p10 = scmp.lt.s32.totalorder %s757_s21, 2 }
  0x15   : > { %p840_p11 = por %p162_p7, %p38_p0  ;;  %s1014_s6 = sand.u32 1, %s753_s20  }
  0x16   : > { %p844_p12 = por %p168_p8, %p44_p3  ;;  %s850_s7 = sshll.u32 %s757_s21, 8 }
  0x17   : > { %s1026_s29 = scalar_select %p840_p11, 1, 0 }
  0x18   : > { %s1027_s30 = scalar_select %p844_p12, 1, 0 }
  0x19   : > { %s854_s8 = sshll.u32 %s1014_s6, 4  ;;  %p856_p13 = pnand %p566_p10, %p40_p5 }
  0x1a   : > { %s213_s10 = sand.u32 1, %s757_s21   ;;  %s1029_s1 = sld [smem:[#allocation16_spill]] }
  0x1b   : > { %s217_s14 = scalar_lea.vmem [#allocation5], %s854_s8  ;;  %s869_s16 = scalar_lea.sflag [#allocation6], %s213_s10 }
  0x1c   : > { %s225_s15 = sshll.u32 %s217_s14, 4  ;;  %p875_p2 = pneg %p856_p13  ;;  %s226_s15 = int_to_ptr.vmem [resolvable:$true] %s225_s15 }
  0x20   : > { %s865_s13 = scalar_lea.hbm %s1029_s1, %s850_s7  ;;  %s610_s11 = scalar_lea.hbm %s1029_s1, 512 }
  0x21   : > { %s605_s17 = scalar_lea.hbm %s865_s13, 256  ;;  %p611_p5 = scmp.lt.s32.totalorder %s865_s13, %s1029_s1 }
  0x22   : > { %p606_p1 = scmp.ne.s32.totalorder %s865_s13, %s605_s17  ;;  %p612_p7 = scmp.lt.s32.totalorder %s610_s11, %s605_s17 }
  0x24   : > { %p608_p3 = pnand %p875_p2, %p606_p1  ;;  %p613_p8 = por %p612_p7, %p611_p5 }
  0x26   : > { %p609_p4 = pneg %p608_p3 }
  0x28   : > { %p614_p10 = pnand %p613_p8, %p609_p4 }
  0x2a   : > { %617 = shalt.err (!%p614_p10)
}
  0x2b   : > { %s618_s10 = scalar_lea.vmem %s226_s15, 256  ;;  %s759_s6 = smov [#allocation5]  }
  0x2c   : > { %p619_p9 = scmp.ne.s32.totalorder %s226_s15, %s618_s10  ;;  %s623_s27 = sshll.u32 %s759_s6, 4  ;;  %s624_s27 = int_to_ptr.vmem [resolvable:$false] %s623_s27 }
  0x2d   : > { %s625_s24 = scalar_lea.vmem %s624_s27, 512  ;;  %p626_p1 = scmp.lt.s32.totalorder %s226_s15, %s624_s27 }
  0x2e   : > { %p621_p0 = pnand %p619_p9, %p875_p2  ;;  %p627_p3 = scmp.lt.s32.totalorder %s625_s24, %s618_s10 }
  0x30   : > { %p622_p12 = pneg %p621_p0  ;;  %p628_p11 = por %p627_p3, %p626_p1 }
  0x32   : > { %p629_p6 = pnand %p628_p11, %p622_p12 }
  0x34   : > { %632 = shalt.err (!%p629_p6)
}
  0x35   : > { %558 = dma.hbm_to_vmem [thread:$0]  (!%p856_p13), %s865_s13, 256, %s226_s15, %s869_s16  }
  0x36   : > { %p249_p9 = scmp.lt.s32.totalorder %s757_s21, 3  ;;  %s1031_s0 = sld [smem:[#allocation15_spill]] }
  0x37   : > { %p1032_p0 = scmp.ge.s32.totalorder %s757_s21, 1  ;;  %s198_s25 = scalar_lea.vmem [#allocation2], %s854_s8 }
  0x38   : > { %s206_s26 = sshll.u32 %s198_s25, 4  ;;  %s1034_s11 = sand.u32 1, %s753_s20   ;;  %s207_s26 = int_to_ptr.vmem [resolvable:$true] %s206_s26 }
  0x39   : > { %p903_p6 = pnand %p1032_p0, %p249_p9  ;;  %s195_s12 = scalar_lea.sflag [#allocation3], %s1034_s11 }
  0x3b   : > { %s1033_s24 = scalar_select %p903_p6, 1, 0 }
  0x3c   : > { %s899_s27 = scalar_lea.hbm %s1031_s0, %s850_s7  ;;  %s638_s10 = scalar_lea.hbm %s1031_s0, 512 }
  0x3d   : > { %s633_s13 = scalar_lea.hbm %s899_s27, 256  ;;  %p639_p5 = scmp.lt.s32.totalorder %s899_s27, %s1031_s0 }
  0x3e   : > { %p634_p11 = scmp.ne.s32.totalorder %s899_s27, %s633_s13  ;;  %p640_p7 = scmp.lt.s32.totalorder %s638_s10, %s633_s13 }
  0x40   : > { %p636_p12 = pnand %p634_p11, %p875_p2  ;;  %p641_p8 = por %p640_p7, %p639_p5 }
  0x42   : > { %p637_p4 = pneg %p636_p12 }
  0x44   : > { %p642_p10 = pnand %p641_p8, %p637_p4 }
  0x46   : > { %645 = shalt.err (!%p642_p10)
}
  0x47   : > { %s646_s25 = scalar_lea.vmem %s207_s26, 256  ;;  %s760_s11 = smov [#allocation2]  }
  0x48   : > { %p647_p1 = scmp.ne.s32.totalorder %s207_s26, %s646_s25  ;;  %s651_s1 = sshll.u32 %s760_s11, 4  ;;  %s652_s1 = int_to_ptr.vmem [resolvable:$false] %s651_s1 }
  0x49   : > { %s653_s20 = scalar_lea.vmem %s652_s1, 512  ;;  %p654_p0 = scmp.lt.s32.totalorder %s207_s26, %s652_s1 }
  0x4a   : > { %p649_p3 = pnand %p647_p1, %p875_p2  ;;  %p655_p11 = scmp.lt.s32.totalorder %s653_s20, %s646_s25 }
  0x4c   : > { %p650_p9 = pneg %p649_p3  ;;  %p656_p12 = por %p655_p11, %p654_p0 }
  0x4e   : > { %p657_p6 = pnand %p656_p12, %p650_p9 }
  0x50   : > { %660 = shalt.err (!%p657_p6)
}
  0x51   : > { %555 = dma.hbm_to_vmem [thread:$0]  (!%p856_p13), %s899_s27, 256, %s207_s26, %s195_s12  }
  0x52   : > { %s242_s14 = scalar_lea.hbm %s1010_s2, %s850_s7  ;;  %s236_s10 = scalar_lea.vmem [#allocation7], %s854_s8 }
  0x53   : > { %s244_s6 = sshll.u32 %s236_s10, 4  ;;  %s661_s17 = scalar_lea.hbm %s242_s14, 256  ;;  %s245_s6 = int_to_ptr.vmem [resolvable:$true] %s244_s6 }
  0x54   : > { %p662_p4 = scmp.ne.s32.totalorder %s242_s14, %s661_s17  ;;  %s666_s25 = scalar_lea.hbm %s1010_s2, 512 }
  0x55   : > { %p667_p6 = scmp.lt.s32.totalorder %s242_s14, %s1010_s2  ;;  %p668_p8 = scmp.lt.s32.totalorder %s666_s25, %s661_s17 }
  0x56   : > { %p664_p5 = pnand %p662_p4, %p875_p2 }
  0x57   : > { %p669_p10 = por %p668_p8, %p667_p6 }
  0x58   : > { %p665_p7 = pneg %p664_p5 }
  0x5a   : > { %p670_p1 = pnand %p669_p10, %p665_p7 }
  0x5c   : > { %673 = shalt.err (!%p670_p1)
}
  0x5d   : > { %s674_s7 = scalar_lea.vmem %s245_s6, 256  ;;  %s761_s8 = smov [#allocation7]  }
  0x5e   : > { %p675_p3 = scmp.ne.s32.totalorder %s245_s6, %s674_s7  ;;  %s679_s27 = sshll.u32 %s761_s8, 4  ;;  %s680_s27 = int_to_ptr.vmem [resolvable:$false] %s679_s27 }
  0x5f   : > { %s681_s26 = scalar_lea.vmem %s680_s27, 512  ;;  %p682_p11 = scmp.lt.s32.totalorder %s245_s6, %s680_s27 }
  0x60   : > { %p677_p9 = pnand %p675_p3, %p875_p2  ;;  %p683_p12 = scmp.lt.s32.totalorder %s681_s26, %s674_s7 }
  0x62   : > { %p678_p0 = pneg %p677_p9  ;;  %p684_p4 = por %p683_p12, %p682_p11 }
  0x64   : > { %p685_p5 = pnand %p684_p4, %p678_p0 }
  0x66   : > { %688 = shalt.err (!%p685_p5)
}
  0x67   : > { %561 = dma.hbm_to_vmem [thread:$0]  (!%p856_p13), %s242_s14, 256, %s245_s6, %s869_s16  }
  0x68   : > { %p1035_p7 = scmp.ne.s32.totalorder %s1033_s24, 0 }
  0x69   : > { %s947_s0 = sand.u32 (!%p1035_p7), 1, %s749_s19   ;;  %p1036_p2 = scmp.ne.s32.totalorder (!%p1035_p7), %s1025_s28, 0 }
  0x6a   : > { %253 = sbr.rel (%p1035_p7) target bundleno = 472 (0x1d8), region = 40  ;;  %s531_s23 = sshll.u32 (!%p1035_p7), %s947_s0, 4 }
  0x6b   : > { %s256_s12 = scalar_lea.sflag (!%p1035_p7), [#allocation3], %s947_s0  ;;  %s259_s13 = scalar_lea.vmem (!%p1035_p7), [#allocation2], %s531_s23 }
  0x6f   : > { %732 = dma.done.wait (%p1036_p2), %s256_s12, 256  }
  0x70   : > { %734 = vsyncadd (%p1036_p2), %s256_s12, 4294967040  ;;  %s264_s9 = sand.u32 1, %s815_s22   ;;  %s268_s24 = scalar_lea.vmem [#allocation5], %s531_s23 }
  0x71   : > { %s265_s16 = scalar_lea.sflag [#allocation6], %s264_s9 }
  0x72   : > { %736 = dma.done.wait (%p1036_p2), %s265_s16, 512  }
  0x73   : > { %738 = vsyncadd (%p1036_p2), %s265_s16, 4294966784  ;;  %v314_v0 = vld [vmem:[%s259_s13] sm:$0xff]  ;;  %s277_s15 = scalar_lea.vmem [#allocation7], %s531_s23  ;;  %v317_v5 = vld [vmem:[%s268_s24 + $0x8] sm:$0xff]  ;;  %s762_s14 = smov 32   ;;  %v330_v10 = vlaneseq }
  0x74   : > { %v316_v1 = vld [vmem:[%s268_s24] sm:$0xff]  ;;  %v319_v3 = vld [vmem:[%s277_s15 + $0x8] sm:$0xff]  ;;  %s534_s1 = sshll.u32 %s947_s0, 3  ;;  %s536_s11 = sshll.u32 %s815_s22, 7 }
  0x75   : > { %v318_v2 = vld [vmem:[%s277_s15] sm:$0xff]  ;;  %v315_v6 = vld [vmem:[%s259_s13 + $0x8] sm:$0xff]  ;;  %v323_v7 = vmul.f32 %v319_v3, %v317_v5  ;;  %v337_v11 = vshrl.u32 %v330_v10, 7  ;;  %601 = vlog2.f32 %v316_v1  ;;  %v331_v12 = vand.u32 127, %v330_v10  ;;  %s313_s20 = scalar_lea.vmem [#allocation8], %s534_s1  ;;  %s403_s26 = scalar_lea.hbm %s1013_s5, %s536_s11 }
  0x76   : > { %v322_v4 = vmul.f32 %v318_v2, %v316_v1  ;;  %603 = vlog2.f32 %v317_v5  ;;  %v320_v15 = vld [vmem:[%s1011_s3] sm:$0x3]  ;;  %v367_v25 = vmul.f32 %v318_v2, %v318_v2  ;;  %v368_v28 = vmul.f32 %v319_v3, %v319_v3  ;;  %s405_s25 = sshll.u32 %s313_s20, 4  ;;  %s392_s23 = scalar_lea.sflag [#allocation4], %s947_s0  ;;  %s968_s25 = int_to_ptr.vmem [resolvable:$true] %s405_s25 }
  0x77   : > { %v325_v9 = vadd.f32 %v323_v7, %v315_v6  ;;  %v338_v13 = vsub.s32 0, %v337_v11  ;;  %v342_v14 = vsub.s32 1, %v337_v11  ;;  %vm332_vm0 = vcmp.lt.s32.totalorder %v331_v12, 32  ;;  %v321_v24 = vld [vmem:[%s1012_s4] sm:$0x3]  ;;  %s689_s12 = scalar_lea.vmem %s968_s25, 128 }
  0x78   : > { %v324_v8 = vadd.f32 %v322_v4, %v314_v0  ;;  %v369_v37 = vmul.f32 0.5, %v367_v25  ;;  %v370_v38 = vmul.f32 0.5, %v368_v28  ;;  %p690_p13 = scmp.ne.s32.totalorder %s968_s25, %s689_s12  ;;  %p1037_p6 = scmp.ne.s32.totalorder %s1026_s29, 0 }
  0x79   : > { %v339_v17 = vrot.slane %v320_v15, %v338_v13  ;;  %v343_v18 = vrot.slane %v320_v15, %v342_v14  ;;  %v358_v32 = vrot.slane %v321_v24, %v338_v13  ;;  %v362_v33 = vrot.slane %v321_v24, %v342_v14  ;;  %s763_s13 = smov [#allocation8]  }
  0x7a   : > { %326 = vrot.lane.b32.xlu0 %v324_v8, %s762_s14  ;;  %p691_p8 = pnand %p690_p13, %p1037_p6  ;;  %s693_s22 = sshll.u32 %s763_s13, 4  ;;  %s694_s22 = int_to_ptr.vmem [resolvable:$false] %s693_s22 }
  0x7b   : > { %s695_s9 = scalar_lea.vmem %s694_s22, 256  ;;  %p696_p1 = scmp.lt.s32.totalorder %s968_s25, %s694_s22 }
  0x7c   : > { %p692_p10 = pneg %p691_p8  ;;  %p697_p3 = scmp.lt.s32.totalorder %s695_s9, %s689_s12 }
  0x7e   : > { %328 = vrot.lane.b32.xlu0 %v325_v9, %s762_s14  ;;  %p698_p9 = por %p697_p3, %p696_p1 }
  0x80   : > { %p699_p0 = pnand %p698_p9, %p692_p10 }
  0x82   : > { %v602_v29 = vpop.eup %601 }
  0x83   : > { %v604_v34 = vpop.eup %603  ;;  %v374_v41 = vmul.f32 0.6931472, %v602_v29 }
  0x84   : > { %v376_v42 = vmul.f32 0.6931472, %v604_v34 }
  0xec   : > { %v327_v16 = vpop.permute.xlu0 %326 }
  0xf0   : > { %v329_v19 = vpop.permute.xlu0 %328 }
  0xf1   : > { %v333_v20 = vsel %vm332_vm0, %v327_v16, %v329_v19  ;;  %v334_v21 = vsel %vm332_vm0, %v329_v19, %v327_v16 }
  0xf2   : > { %v346_v22 = vmul.f32 %v339_v17, %v334_v21  ;;  %v347_v23 = vmul.f32 %v343_v18, %v333_v20 }
  0xf4   : > { %v348_v26 = vsub.f32 %v324_v8, %v346_v22  ;;  %v349_v27 = vsub.f32 %v325_v9, %v347_v23 }
  0xf6   : > { %v350_v30 = vmul.f32 %v348_v26, %v348_v26  ;;  %v351_v31 = vmul.f32 %v349_v27, %v349_v27 }
  0xf8   : > { %v352_v35 = vmul.f32 0.5, %v350_v30  ;;  %v353_v36 = vmul.f32 0.5, %v351_v31 }
  0xfa   : > { %v365_v39 = vmul.f32 %v358_v32, %v352_v35  ;;  %v366_v40 = vmul.f32 %v362_v33, %v353_v36 }
  0xfc   : > { %v371_v43 = vsub.f32 %v365_v39, %v369_v37  ;;  %v372_v44 = vsub.f32 %v366_v40, %v370_v38 }
  0xfe   : > { %v377_v45 = vsub.f32 %v371_v43, %v374_v41  ;;  %v378_v46 = vsub.f32 %v372_v44, %v376_v42 }
 0x100   : > { %v379_v47 = vadd.f32 %v378_v46, %v377_v45 }
 0x102   : > { %380 = vadd.xlane.f32.xlu1 %v379_v47 }
 0x18b   : > { %v381_v48 = vpop.xlane.xlu1 %380 }
 0x18c   : > { %v382_v49 = vrot.slane %v381_v48, 4 }
 0x18e   : > { %v383_v50 = vadd.f32 %v382_v49, %v381_v48 }
 0x190   : > { %v384_v51 = vrot.slane %v383_v50, 2 }
 0x192   : > { %v385_v52 = vadd.f32 %v384_v51, %v383_v50 }
 0x194   : > { %v386_v53 = vrot.slane %v385_v52, 1 }
 0x196   : > { %v387_v54 = vadd.f32 %v386_v53, %v385_v52 }
 0x198   : > { %542 = vpush %v387_v54 }
 0x1c9   : > { %s543_s7 = spop %542 }
 0x1ca   : > { %v389_v55 = vstv %s543_s7 }
 0x1cb   : > { %390 = vst [vmem:[%s313_s20] sm:$0xff] %v389_v55 }
 0x1cc   : > { %702 = shalt.err (!%p699_p0)
}
 0x1cd   : > { %s703_s16 = scalar_lea.hbm %s403_s26, 128  ;;  %s707_s15 = scalar_lea.hbm %s1013_s5, 256 }
 0x1ce   : > { %p704_p11 = scmp.ne.s32.totalorder %s403_s26, %s703_s16  ;;  %p708_p5 = scmp.lt.s32.totalorder %s403_s26, %s1013_s5 }
 0x1cf   : > { %p709_p7 = scmp.lt.s32.totalorder %s707_s15, %s703_s16 }
 0x1d0   : > { %p705_p12 = pnand %p704_p11, %p1037_p6 }
 0x1d1   : > { %p710_p2 = por %p709_p7, %p708_p5 }
 0x1d2   : > { %p706_p4 = pneg %p705_p12 }
 0x1d4   : > { %p711_p13 = pnand %p710_p2, %p706_p4 }
 0x1d6   : > { %714 = shalt.err (!%p711_p13)
}
 0x1d7   : > { %550 = dma.vmem_to_hbm [thread:$0]  (%p1037_p6), %s968_s25, 128, %s403_s26, %s392_s23  }
 0x1d8 PF: > { %s417_s10 = sand.u32 1, %s745_s18   ;;  %p1038_p8 = scmp.ne.s32.totalorder %s1027_s30, 0 }
 0x1d9   : > { %p1039_p10 = scmp.ge.s32.totalorder %s757_s21, 2  ;;  %s418_s6 = scalar_lea.sflag [#allocation4], %s417_s10 }
 0x1db   : > { %p563_p1 = pnand %p1039_p10, %p1038_p8 }
 0x1dd   : > { %p564_p3 = pneg %p563_p1 }
 0x1df   : > { %740 = dma.done.wait (%p564_p3), %s418_s6, 128  }
 0x1e0   : > { %742 = vsyncadd (%p564_p3), %s418_s6, 4294967168  ;;  %s1040_s21 = sld [smem:[#allocation13_spill]]  ;;  %s1043_s18 = smov %s749_s19 }
 0x1e1   : > { %s1041_s17 = sld [smem:[#allocation12_spill]] }
 0x1e2   : > { %s1042_s20 = sld [smem:[#allocation14_spill]] }
 0x1e6   : > { %p21_p9 = scmp.ge.s32.totalorder %s1040_s21, 4  }
 0x1e7   : > { %s1044_s19 = smov %s1041_s17 }
 0x1e8   :  { %23 = sbr.rel (!%p21_p9) target bundleno = 10 (0xa), region = 109 }
 0x1ed   :  { %423 = vsyncpa [#allocation3], 1 }
 0x1ee   :  { %425 = vsyncpa [#allocation3 + $0x1], 1 }
 0x1ef   :  { %426 = vsyncpa [#allocation6], 1 }
 0x1f0   :  { %428 = vsyncpa [#allocation6 + $0x1], 1 }
 0x1f1   :  { %429 = vsyncpa [#allocation4], 1 }
 0x1f2   :  { %431 = vsyncpa [#allocation4 + $0x1], 1 }

</bundles_post_ra>
